<compile_context>
chip_gen: v7x
topology: tpu7x:2x2x1
jax: 0.10.0
libtpu: 0.0.40
codegen_flags: <defaults>
</compile_context>

<pallas_src>
import functools

import jax
import jax.numpy as jnp
from jax.experimental import pallas as pl
from jax.experimental.pallas import tpu as pltpu


def _round_up(n, m):
    return ((n + m - 1) // m) * m


def bow_decoder_kernel(x_ref, w1_ref, b1_ref, w2_ref, b2_ref, o_ref):
    # fc1: bf16 MXU operands, f32 accumulate; bias + ReLU in f32.
    h = jnp.dot(x_ref[...], w1_ref[...],
                preferred_element_type=jnp.float32) + b1_ref[...]
    h = jnp.maximum(h, 0.0)
    # fc2: cast activations back to bf16 for the MXU; f32 accumulate + f32 bias.
    logits = jnp.dot(h.astype(jnp.bfloat16), w2_ref[...],
                     preferred_element_type=jnp.float32) + b2_ref[...]
    # Numerically-stable softmax over the real vocab lanes.  Exact division for the
    # normalizer so rows sum to 1 (approx reciprocal only buys an EUP slot we don't need).
    m = jnp.max(logits, axis=1, keepdims=True)
    e = jnp.exp(logits - m)
    denom = jnp.sum(e, axis=1, keepdims=True)
    o_ref[...] = (e / denom).astype(o_ref.dtype)


def prepare_bow_decoder_params(w1, b1, w2, b2):
    """One-time parameter prep: bf16 weights for the MXU, f32 biases for the epilogue."""
    return (w1.astype(jnp.bfloat16), b1.astype(jnp.float32),
            w2.astype(jnp.bfloat16), b2.astype(jnp.float32))


@functools.partial(jax.jit, static_argnames=("max_batch_tile",))
def bow_decoder(x, w1_bf16, b1_f32, w2_bf16, b2_f32, max_batch_tile=512):
    B, latent = x.shape
    inner = w1_bf16.shape[1]
    vocab = w2_bf16.shape[1]

    # Batch tile: multiple of 16 (bf16 sublane packing).  When there is enough batch
    # to split, keep >= 2 grid steps so v7x can shard the batch axis over both TCs.
    Bp16 = _round_up(B, 16)
    if Bp16 <= 16:
        TB = Bp16
    else:
        TB = min(max_batch_tile, _round_up((Bp16 + 1) // 2, 16))
    Bp = _round_up(B, TB)
    grid = (Bp // TB,)

    xp = x.astype(jnp.bfloat16)
    if Bp != B:
        # Pad only the batch axis (zero rows produce valid softmax rows, sliced away).
        xp = jnp.zeros((Bp, latent), jnp.bfloat16).at[:B].set(xp)

    cost = pl.CostEstimate(
        flops=2 * Bp * (latent * inner + inner * vocab),
        transcendentals=Bp * vocab,
        bytes_accessed=(2 * (Bp * latent + latent * inner + inner * vocab)   # bf16
                        + 4 * (inner + vocab + Bp * vocab)),                 # f32
    )

    out = pl.pallas_call(
        bow_decoder_kernel,
        out_shape=jax.ShapeDtypeStruct((Bp, vocab), jnp.float32),
        grid_spec=pltpu.PrefetchScalarGridSpec(
            num_scalar_prefetch=0,
            grid=grid,
            in_specs=[
                pl.BlockSpec((TB, latent), lambda i: (i, 0)),     # x: batch-tiled
                pl.BlockSpec((latent, inner), lambda i: (0, 0)),  # w1: resident
                pl.BlockSpec((1, inner), lambda i: (0, 0)),       # b1: resident
                pl.BlockSpec((inner, vocab), lambda i: (0, 0)),   # w2: resident
                pl.BlockSpec((1, vocab), lambda i: (0, 0)),       # b2: resident
            ],
            out_specs=pl.BlockSpec((TB, vocab), lambda i: (i, 0)),
        ),
        compiler_params=pltpu.CompilerParams(
            dimension_semantics=("parallel",),
        ),
        cost_estimate=cost,
    )(xp, w1_bf16, b1_f32, w2_bf16, b2_f32)

    return out[:B]


def reference(x, w1, b1, w2, b2):
    h = jnp.maximum(x @ w1 + b1, 0.0)
    logits = h @ w2 + b2
    return jax.nn.softmax(logits, axis=1)


if __name__ == "__main__":
    # module hyper-params (small, consistent with BOWDecoder)
    latent_size = 32
    vocab_size = 64
    inner_size = (latent_size + vocab_size) // 2  # 48
    batch = 8

    key = jax.random.PRNGKey(0)
    kx, k1, k2, k3, k4 = jax.random.split(key, 5)

    # deterministic parameter init (uniform, ~PyTorch Linear fan-in scale)
    x = jax.random.normal(kx, (batch, latent_size), dtype=jnp.float32)
    lim1 = 1.0 / (latent_size ** 0.5)
    lim2 = 1.0 / (inner_size ** 0.5)
    w1 = jax.random.uniform(k1, (latent_size, inner_size), jnp.float32, -lim1, lim1)
    b1 = jax.random.uniform(k2, (1, inner_size), jnp.float32, -lim1, lim1)
    w2 = jax.random.uniform(k3, (inner_size, vocab_size), jnp.float32, -lim2, lim2)
    b2 = jax.random.uniform(k4, (1, vocab_size), jnp.float32, -lim2, lim2)

    params = prepare_bow_decoder_params(w1, b1, w2, b2)  # one-time, hoisted out of apply
    out = bow_decoder(x, *params)
    out = jax.block_until_ready(out)

    ref = reference(x, w1, b1, w2, b2)
    assert out.shape == (batch, vocab_size)
    # bf16 MXU operands vs f32 reference: per-element deviation well under 1e-3 here
    assert jnp.allclose(out, ref, atol=2e-3, rtol=2e-2), "mismatch vs JAX reference"
    # exact normalizer -> rows sum to 1 up to f32 rounding (softmax over dim=1)
    assert jnp.allclose(jnp.sum(out, axis=1), 1.0, atol=1e-3)

    print("KERNEL_OK")
</pallas_src>

<mosaic_0001>
module attributes {stable_mosaic.version = 11 : i64} {
  func.func @bow_decoder_kernel(%arg0: i32, %arg1: memref<16x32xbf16, #tpu.memory_space<vmem>>, %arg2: memref<32x48xbf16, #tpu.memory_space<vmem>>, %arg3: memref<1x48xf32, #tpu.memory_space<vmem>>, %arg4: memref<48x64xbf16, #tpu.memory_space<vmem>>, %arg5: memref<1x64xf32, #tpu.memory_space<vmem>>, %arg6: memref<16x64xf32, #tpu.memory_space<vmem>>) attributes {dimension_semantics = [#tpu.dimension_semantics<parallel>], iteration_bounds = array<i64: 1>, scalar_prefetch = 0 : i64, scratch_operands = 0 : i64, tpu.core_type = #tpu.core_type<tc>, window_params = [{transform_indices = @transform_0, window_bounds = array<i64: 16, 32>}, {pipeline_mode = #tpu.pipeline_mode<synchronous>, transform_indices = @transform_1, window_bounds = array<i64: 32, 48>}, {pipeline_mode = #tpu.pipeline_mode<synchronous>, transform_indices = @transform_2, window_bounds = array<i64: 1, 48>}, {pipeline_mode = #tpu.pipeline_mode<synchronous>, transform_indices = @transform_3, window_bounds = array<i64: 48, 64>}, {pipeline_mode = #tpu.pipeline_mode<synchronous>, transform_indices = @transform_4, window_bounds = array<i64: 1, 64>}, {transform_indices = @transform_5, window_bounds = array<i64: 16, 64>}]} {
    %c0 = arith.constant 0 : index
    %c0_0 = arith.constant 0 : index
    %0 = vector.load %arg1[%c0, %c0_0] : memref<16x32xbf16, #tpu.memory_space<vmem>>, vector<16x32xbf16>
    %c0_1 = arith.constant 0 : index
    %c0_2 = arith.constant 0 : index
    %1 = vector.load %arg2[%c0_1, %c0_2] : memref<32x48xbf16, #tpu.memory_space<vmem>>, vector<32x48xbf16>
    %cst = arith.constant dense<0.000000e+00> : vector<16x48xf32>
    %2 = tpu.matmul %0, %1, %cst {dimension_numbers = #tpu.dot_dimension_numbers<[1], [0], [0], [1], [0, 0, 1, 1], [], []>} : vector<16x32xbf16>, vector<32x48xbf16>, vector<16x48xf32> -> vector<16x48xf32>
    %c0_3 = arith.constant 0 : index
    %c0_4 = arith.constant 0 : index
    %3 = vector.load %arg3[%c0_3, %c0_4] : memref<1x48xf32, #tpu.memory_space<vmem>>, vector<1x48xf32>
    %4 = vector.broadcast %3 : vector<1x48xf32> to vector<16x48xf32>
    %5 = arith.addf %2, %4 : vector<16x48xf32>
    %cst_5 = arith.constant 0.000000e+00 : f32
    %6 = vector.broadcast %cst_5 : f32 to vector<16x48xf32>
    %7 = arith.maximumf %5, %6 : vector<16x48xf32>
    %8 = arith.truncf %7 : vector<16x48xf32> to vector<16x48xbf16>
    %c0_6 = arith.constant 0 : index
    %c0_7 = arith.constant 0 : index
    %9 = vector.load %arg4[%c0_6, %c0_7] : memref<48x64xbf16, #tpu.memory_space<vmem>>, vector<48x64xbf16>
    %cst_8 = arith.constant dense<0.000000e+00> : vector<16x64xf32>
    %10 = tpu.matmul %8, %9, %cst_8 {dimension_numbers = #tpu.dot_dimension_numbers<[1], [0], [0], [1], [0, 0, 1, 1], [], []>} : vector<16x48xbf16>, vector<48x64xbf16>, vector<16x64xf32> -> vector<16x64xf32>
    %c0_9 = arith.constant 0 : index
    %c0_10 = arith.constant 0 : index
    %11 = vector.load %arg5[%c0_9, %c0_10] : memref<1x64xf32, #tpu.memory_space<vmem>>, vector<1x64xf32>
    %12 = vector.broadcast %11 : vector<1x64xf32> to vector<16x64xf32>
    %13 = arith.addf %10, %12 : vector<16x64xf32>
    %cst_11 = arith.constant dense<0xFF800000> : vector<16xf32>
    %14 = vector.multi_reduction <maximumf>, %13, %cst_11 [1] : vector<16x64xf32> to vector<16xf32>
    %15 = vector.shape_cast %14 : vector<16xf32> to vector<16x1xf32>
    %16 = vector.broadcast %15 : vector<16x1xf32> to vector<16x64xf32>
    %17 = arith.subf %13, %16 : vector<16x64xf32>
    %18 = math.exp %17 : vector<16x64xf32>
    %cst_12 = arith.constant dense<0.000000e+00> : vector<16xf32>
    %19 = vector.multi_reduction <add>, %18, %cst_12 [1] : vector<16x64xf32> to vector<16xf32>
    %20 = vector.shape_cast %19 : vector<16xf32> to vector<16x1xf32>
    %21 = vector.broadcast %20 : vector<16x1xf32> to vector<16x64xf32>
    %22 = arith.divf %18, %21 : vector<16x64xf32>
    %c0_13 = arith.constant 0 : index
    %c0_14 = arith.constant 0 : index
    %23 = vector.load %arg6[%c0_13, %c0_14] : memref<16x64xf32, #tpu.memory_space<vmem>>, vector<16x64xf32>
    tpu.vector_store %arg6[%c0_13, %c0_14], %22 {strides = array<i32>} : memref<16x64xf32, #tpu.memory_space<vmem>>, vector<16x64xf32>,
    return
  }
  func.func @transform_0(%arg0: i32) -> (i32, i32) {
    %c0_i32 = arith.constant 0 : i32
    %c0_i32_0 = arith.constant 0 : i32
    return %arg0, %c0_i32 : i32, i32
  }
  func.func @transform_1(%arg0: i32) -> (i32, i32) {
    %c0_i32 = arith.constant 0 : i32
    %c0_i32_0 = arith.constant 0 : i32
    %c0_i32_1 = arith.constant 0 : i32
    return %c0_i32, %c0_i32_0 : i32, i32
  }
  func.func @transform_2(%arg0: i32) -> (i32, i32) {
    %c0_i32 = arith.constant 0 : i32
    %c0_i32_0 = arith.constant 0 : i32
    %c0_i32_1 = arith.constant 0 : i32
    return %c0_i32, %c0_i32_0 : i32, i32
  }
  func.func @transform_3(%arg0: i32) -> (i32, i32) {
    %c0_i32 = arith.constant 0 : i32
    %c0_i32_0 = arith.constant 0 : i32
    %c0_i32_1 = arith.constant 0 : i32
    return %c0_i32, %c0_i32_0 : i32, i32
  }
  func.func @transform_4(%arg0: i32) -> (i32, i32) {
    %c0_i32 = arith.constant 0 : i32
    %c0_i32_0 = arith.constant 0 : i32
    %c0_i32_1 = arith.constant 0 : i32
    return %c0_i32, %c0_i32_0 : i32, i32
  }
  func.func @transform_5(%arg0: i32) -> (i32, i32) {
    %c0_i32 = arith.constant 0 : i32
    %c0_i32_0 = arith.constant 0 : i32
    return %arg0, %c0_i32 : i32, i32
  }
}

</mosaic_0001>

<bundles_post_ra>
// kernel: bow_decoder.1
= control target key start
LH: loop header
LB: loop body
LE: loop exit
PB: predicated region body
PF: predicated region fallthrough
CT: control target
= control target key end

     0   :  { %10 = vsyncpa [#allocation3], 0  ;;  %s297_s18 = smov [#allocation2]   ;;  %s374_s0 = inlined_call_operand.vmem [shape: bf16[16,32], index: 0, kind: input, shape index: {}]   ;;  %s375_s1 = inlined_call_operand.hbm [shape: bf16[32,48], index: 1, kind: input, shape index: {}]   ;;  %s376_s2 = inlined_call_operand.vmem [shape: f32[1,48], index: 2, kind: input, shape index: {}]   ;;  %s377_s3 = inlined_call_operand.vmem [shape: bf16[48,64], index: 3, kind: input, shape index: {}]   ;;  %s378_s4 = inlined_call_operand.vmem [shape: f32[1,64], index: 4, kind: input, shape index: {}]   ;;  %s379_s5 = inlined_call_operand.vmem [shape: f32[16,64], index: 5, kind: output, shape index: {}]  }
   0x1   :  { %s18_s19 = sshll.u32 %s297_s18, 4  ;;  %s273_s22 = scalar_lea.hbm %s375_s1, 256  ;;  %s19_s19 = int_to_ptr.vmem [resolvable:$true] %s18_s19 }
   0x2   :  { %p274_p0 = scmp.ne.s32.totalorder %s375_s1, %s273_s22  ;;  %p277_p1 = scmp.lt.u32.totalorder %s273_s22, %s375_s1 }
   0x4   :  { %p279_p2 = pnand %p277_p1, %p274_p0 }
   0x6   :  { %282 = shalt.err (!%p279_p2)
}
   0x7   :  { %s283_s27 = scalar_lea.vmem %s19_s19, 256  ;;  %p288_p4 = scmp.lt.s32.totalorder %s19_s19, %s19_s19 }
   0x8   :  { %p284_p3 = scmp.ne.s32.totalorder %s19_s19, %s283_s27  ;;  %p289_p5 = scmp.lt.s32.totalorder %s283_s27, %s283_s27 }
   0xa   :  { %p290_p6 = por %p289_p5, %p288_p4 }
   0xc   :  { %p291_p7 = pnand %p290_p6, %p284_p3 }
   0xe   :  { %294 = shalt.err (!%p291_p7)
}
   0xf   :  { %s298_s28 = smov 64   ;;  %s299_s29 = smov 4  }
  0x10   :  { %24 = dma.hbm_to_vmem [thread:$0]  %s375_s1, 256, %s19_s19, [#allocation3], %s298_s28, %s298_s28, %s299_s29  }
  0x11   :  { %295 = dma.done.wait [#allocation3], 256  }
  0x12   :  { %296 = vsyncadd [#allocation3], 4294967040  ;;  %v300_v0 = vmov 0.0   ;;  %vm301_vm0 = vmmov 0   ;;  %v259_v1 = vld [vmem:[#allocation2] sm:$0xff]   ;;  %v260_v2 = vld [vmem:[#allocation2 + $0x8] sm:$0xff]  }
  0x13   :  { %236 = vmatprep.subr.bf16.mxu0 %v300_v0  ;;  %240 = vmatprep.mubr.msk.bf16.mxu0 %vm301_vm0, %v300_v0  ;;  %v262_v3 = vld [vmem:[%s377_s3] sm:$0xff]   ;;  %vm65_vm1 = vcmask 261120   ;;  %v263_v5 = vld [vmem:[%s377_s3 + $0x8] sm:$0xff]   ;;  %v264_v6 = vld [vmem:[%s377_s3 + $0x10] sm:$0xff]   ;;  %vm144_vm2 = vcmask 392192   ;;  %vm189_vm3 = vcmask 523264  }
  0x14   :  { %244 = vmatprep.subr.bf16.mxu1 %v300_v0  ;;  %250 = vmatprep.mubr.msk.bf16.mxu1 %vm301_vm0, %v300_v0  ;;  %v261_v4 = vld [vmem:[%s374_s0] sm:$0xff]  }
  0x15   :  { %237 = vmatpush3.bf16.msra.mxu0 %v259_v1  ;;  %245 = vmatpush3.bf16.msra.mxu1 %v262_v3  ;;  %v219_v7 = vld [vmem:[%s376_s2] ss:$0 sm:$0xff] }
  0x16   :  { %238 = vmatprep.subr.bf16.mxu0 %v300_v0  ;;  %246 = vmatprep.subr.bf16.mxu1 %v300_v0  ;;  %v224_v17 = vld [vmem:[%s378_s4] ss:$0 sm:$0xff] }
  0x19   :  { %239 = vmatpush3.bf16.msra.mxu0 %v260_v2  ;;  %247 = vmatpush3.bf16.msra.mxu1 %v263_v5 }
  0x1a   :  { %248 = vmatprep.subr.bf16.mxu1 %v300_v0 }
  0x1c   :  { %241 = vmatmul.mubr.msk.bf16.vlgmr.msra.gmra.mrb[0].mxu0 %vm65_vm1, %v261_v4 }
  0x1d   :  { %249 = vmatpush3.bf16.msra.mxu1 %v264_v6 }
  0xef   :  { %v103_v8 = vpop.f32.mrb[0].mxu0 }
  0xf0   :  { %v104_v9 = vadd.f32 %v219_v7, %v103_v8  ;;  %v242_v10 = vpop.f32.mrb[1].mxu0 }
  0xf1   :  { %v106_v11 = vpop.f32.mrb[2].mxu0 }
  0xf2   :  { %v107_v12 = vadd.f32 %v219_v7, %v106_v11  ;;  %v243_v13 = vpop.f32.mrb[3].mxu0  ;;  %v110_v14 = vmax.f32 %v104_v9, 0.0 }
  0xf4   :  { %v111_v15 = vmax.f32 %v107_v12, 0.0 }
  0xf6   :  { %v112_v16 = vpack.c.bf16 %v111_v15, %v110_v14 }
  0xf8   :  { %251 = vmatmul.mubr.msk.bf16.vlgmr.msra.gmra.mrb[0].mxu1 %vm144_vm2, %v112_v16 }
 0x1cb   :  { %v182_v18 = vpop.f32.mrb[0].mxu1 }
 0x1cc   :  { %v183_v19 = vadd.f32 %v224_v17, %v182_v18  ;;  %v252_v20 = vpop.f32.mrb[1].mxu1 }
 0x1cd   :  { %v185_v21 = vpop.f32.mrb[2].mxu1 }
 0x1ce   :  { %v186_v22 = vadd.f32 %v224_v17, %v185_v21  ;;  %v253_v23 = vpop.f32.mrb[3].mxu1  ;;  %v190_v24 = vsel %vm189_vm3, %v183_v19, -inf }
 0x1cf   :  { %191 = vmax.xlane.f32.xlu0 %v190_v24 }
 0x1d0   :  { %v193_v25 = vsel %vm189_vm3, %v186_v22, -inf }
 0x1d3   :  { %194 = vmax.xlane.f32.xlu0 %v193_v25 }
 0x25c   :  { %v192_v26 = vpop.xlane.xlu0 %191 }
 0x25d   :  { %v196_v27 = vsub.f32 %v183_v19, %v192_v26 }
 0x25f   :  { %v198_v28 = vmul.f32 1.442695, %v196_v27 }
 0x260   :  { %v195_v29 = vpop.xlane.xlu0 %194 }
 0x261   :  { %265 = vpow2.f32 %v198_v28  ;;  %v197_v30 = vsub.f32 %v186_v22, %v195_v29 }
 0x263   :  { %v200_v31 = vmul.f32 1.442695, %v197_v30 }
 0x265   :  { %267 = vpow2.f32 %v200_v31 }
 0x26b   :  { %v266_v32 = vpop.eup %265 }
 0x26c   :  { %v202_v33 = vsel %vm189_vm3, %v266_v32, 0.0 }
 0x26d   :  { %203 = vadd.xlane.f32.xlu1 %v202_v33 }
 0x26f   :  { %v268_v34 = vpop.eup %267 }
 0x270   :  { %v205_v35 = vsel %vm189_vm3, %v268_v34, 0.0 }
 0x271   :  { %206 = vadd.xlane.f32.xlu1 %v205_v35 }
 0x2fa   :  { %v204_v36 = vpop.xlane.xlu1 %203 }
 0x2fb   :  { %269 = vrcp.f32 %v204_v36 }
 0x2fe   :  { %v207_v37 = vpop.xlane.xlu1 %206 }
 0x2ff   :  { %271 = vrcp.f32 %v207_v37 }
 0x305   :  { %v270_v38 = vpop.eup %269 }
 0x306   :  { %v209_v39 = vmul.f32 %v270_v38, %v266_v32 }
 0x308   :  { %212 = vst.msk [vmem:[%s379_s5] sm:$0xff] %vm189_vm3, %v209_v39 }
 0x309   :  { %v272_v40 = vpop.eup %271 }
 0x30a   :  { %v211_v41 = vmul.f32 %v272_v40, %v268_v34 }
 0x30c   :  { %213 = vst.msk [vmem:[%s379_s5 + $0x8] sm:$0xff] %vm189_vm3, %v211_v41 }
 0x30d   :  { %218 = vsyncpa [#allocation3], 1 }

</bundles_post_ra>
